<compile_context>
chip_gen: v5e
topology: v5e:2x2
jax: 0.10.0
libtpu: 0.0.40
codegen_flags: <defaults>
</compile_context>

<pallas_src>
import functools
import math

import jax
import jax.numpy as jnp
from jax.experimental import pallas as pl
from jax.experimental.pallas import tpu as pltpu


def _round_up(x, m):
    return (x + m - 1) // m * m


def _vmem_budget_bytes():
    """Chip-aware VMEM budget (leave ~25% headroom for compiler scratch/temporaries)."""
    cap = 128 * 1024 * 1024
    try:
        cap = int(getattr(pltpu.get_tpu_info(), "vmem_capacity_bytes", cap))
    except Exception:  # pragma: no cover - e.g. interpret mode / non-TPU tracing
        pass
    return int(cap * 0.75), cap


# ---------------------------------------------------------------------------
# Kernel bodies
# ---------------------------------------------------------------------------

def _gelu(h, use_tanh):
    if use_tanh:
        # EUP tanh path (optional; changes numerics vs torch's exact GELU).
        return jax.nn.gelu(h, approximate=True)
    # Exact erf-based GELU (torch.nn.GELU() default), computed in f32.
    return 0.5 * h * (1.0 + jax.lax.erf(h * 0.7071067811865476))


def _make_kernel(use_scratch, use_tanh_gelu):
    """Grid: (row tiles, hidden tiles); axis 1 (hidden) is the reduction axis.

      x_ref:  (tm, dim_p)   resident row tile
      w1_ref: (dim_p, tk)   streamed hidden-slice of W1
      b1_ref: (1, tk)       hidden-slice of b1 (f32)
      w2_ref: (tk, dim_p)   streamed hidden-slice of W2
      b2_ref: (1, dim_p)    b2 (f32), folded into the accumulator init
      o_ref:  (tm, dim_p)   output tile (resident across the hidden axis)
    """

    if use_scratch:
        # Non-f32 output: accumulate in an f32 VMEM scratch, flush on the last k step.
        def kernel(x_ref, w1_ref, b1_ref, w2_ref, b2_ref, o_ref, acc_ref):
            k = pl.program_id(1)

            @pl.when(k == 0)
            def _init():
                acc_ref[...] = jnp.broadcast_to(
                    b2_ref[...].astype(jnp.float32), acc_ref.shape)

            h = jnp.dot(x_ref[...], w1_ref[...],
                        preferred_element_type=jnp.float32)
            h = h + b1_ref[...].astype(jnp.float32)
            h = _gelu(h, use_tanh_gelu)
            # Dropout(p=0.0) -> identity.
            acc_ref[...] += jnp.dot(h.astype(w2_ref.dtype), w2_ref[...],
                                    preferred_element_type=jnp.float32)

            @pl.when(k == pl.num_programs(1) - 1)
            def _flush():
                o_ref[...] = acc_ref[...].astype(o_ref.dtype)

    else:
        # f32 output: accumulate directly into the resident output block (no scratch).
        def kernel(x_ref, w1_ref, b1_ref, w2_ref, b2_ref, o_ref):
            k = pl.program_id(1)

            @pl.when(k == 0)
            def _init():
                o_ref[...] = jnp.broadcast_to(b2_ref[...], o_ref.shape)

            h = jnp.dot(x_ref[...], w1_ref[...],
                        preferred_element_type=jnp.float32)
            h = h + b1_ref[...]
            h = _gelu(h, use_tanh_gelu)
            # Dropout(p=0.0) -> identity.
            o_ref[...] += jnp.dot(h.astype(w2_ref.dtype), w2_ref[...],
                                  preferred_element_type=jnp.float32)

    return kernel


# ---------------------------------------------------------------------------
# Parameter preparation (hoisted out of the per-call path)
# ---------------------------------------------------------------------------

def prepare_params(w1, b1, w2, b2, *, compute_dtype=jnp.bfloat16):
    """Pad (to 128-aligned dims) and cast the FFN weights ONCE.

    w1: (dim, hidden); b1: (hidden,); w2: (hidden, dim); b2: (dim,).
    Weights are stored (in_features, out_features), i.e. pre-transposed for row-major
    matmul.  Padding is skipped entirely when the dims are already 128-aligned.
    """
    dim, hidden = w1.shape
    dim_p = _round_up(dim, 128)
    hidden_p = _round_up(hidden, 128)

    def pad2(a, rows, cols):
        pr, pc = rows - a.shape[0], cols - a.shape[1]
        return a if (pr == 0 and pc == 0) else jnp.pad(a, ((0, pr), (0, pc)))

    def pad1(a, n):
        return a if a.shape[0] == n else jnp.pad(a, (0, n - a.shape[0]))

    w1_p = pad2(w1.astype(compute_dtype), dim_p, hidden_p)
    w2_p = pad2(w2.astype(compute_dtype), hidden_p, dim_p)
    b1_p = pad1(b1.astype(jnp.float32), hidden_p).reshape(1, hidden_p)
    b2_p = pad1(b2.astype(jnp.float32), dim_p).reshape(1, dim_p)

    return {"w1": w1_p, "b1": b1_p, "w2": w2_p, "b2": b2_p, "dim": dim, "hidden": hidden}


# ---------------------------------------------------------------------------
# pallas_call wrapper
# ---------------------------------------------------------------------------

@functools.partial(jax.jit, static_argnames=("tm_max", "tk_max", "use_tanh_gelu"))
def _ffn_2d(x2d, w1_p, b1_p, w2_p, b2_p, *, tm_max, tk_max, use_tanh_gelu):
    M, dim = x2d.shape
    dim_p, hidden_p = w1_p.shape
    cdt = w1_p.dtype
    out_dtype = x2d.dtype
    use_scratch = jnp.dtype(out_dtype) != jnp.dtype(jnp.float32)

    budget, vmem_cap = _vmem_budget_bytes()
    csize = jnp.dtype(cdt).itemsize
    osize = jnp.dtype(out_dtype).itemsize

    tm_max = max(int(tm_max), 8)
    tk_max = max(int(tk_max), 128)

    # --- hidden (reduction) tile: multiple of 128 that divides hidden_p, <= tk_max ---
    H = hidden_p // 128
    nk = next(n for n in range(max(1, math.ceil(hidden_p / tk_max)), H + 1) if H % n == 0)
    tk_eff = hidden_p // nk

    # --- row tile: balanced so last-tile padding waste stays small ---
    ni = max(1, math.ceil(M / tm_max))
    # On small-VMEM chips (v7x: 64 MiB/TC, 2 TCs) make sure the "parallel" axis has
    # extent >= 2 so both TensorCores get work.
    if vmem_cap <= 96 * 1024 * 1024 and ni == 1 and M >= 16:
        ni = 2
    tm_eff = _round_up(math.ceil(M / ni), 8)

    # --- auto-shrink tiles until the (double-buffered) footprint fits the VMEM budget ---
    def fits(tm, tk):
        f = 2 * tm * dim_p * csize           # x row tile (double-buffered)
        f += 2 * dim_p * tk * csize          # w1 hidden-slice
        f += 2 * tk * dim_p * csize          # w2 hidden-slice
        f += 2 * (tk + dim_p) * 4            # biases
        f += 2 * tm * dim_p * osize          # output tile
        if use_scratch:
            f += tm * dim_p * 4              # f32 accumulator
        f += 4 * tm * tk * 4                 # in-flight f32 matmul/GELU temporaries
        return f <= budget

    while not fits(tm_eff, tk_eff) and tk_eff > 128:
        nk_next = None
        for n in range(nk + 1, H + 1):
            if H % n == 0:
                nk_next = n
                break
        if nk_next is None:
            break
        nk = nk_next
        tk_eff = hidden_p // nk
    while not fits(tm_eff, tk_eff) and tm_eff > 8:
        ni += 1
        tm_eff = _round_up(math.ceil(M / ni), 8)

    M_p = ni * tm_eff
    grid = (ni, nk)

    # --- activation padding/cast (cheap; weights were prepared once, outside) ---
    x2 = x2d if x2d.dtype == cdt else x2d.astype(cdt)
    if (M_p, dim_p) != (M, dim):
        x2 = jnp.pad(x2, ((0, M_p - M), (0, dim_p - dim)))

    kernel = _make_kernel(use_scratch, use_tanh_gelu)
    scratch_shapes = [pltpu.VMEM((tm_eff, dim_p), jnp.float32)] if use_scratch else []

    cost = pl.CostEstimate(
        flops=4 * M_p * dim_p * hidden_p,            # two matmuls
        transcendentals=M_p * hidden_p,              # GELU erf/tanh
        bytes_accessed=(M_p * dim_p * (csize + osize)
                        + ni * 2 * dim_p * hidden_p * csize
                        + (hidden_p + dim_p) * 4),
    )

    out2d = pl.pallas_call(
        kernel,
        out_shape=jax.ShapeDtypeStruct((M_p, dim_p), out_dtype),
        grid_spec=pltpu.PrefetchScalarGridSpec(
            num_scalar_prefetch=0,
            grid=grid,
            in_specs=[
                pl.BlockSpec((tm_eff, dim_p), lambda i, k: (i, 0)),   # x row tile
                pl.BlockSpec((dim_p, tk_eff), lambda i, k: (0, k)),   # w1 hidden-slice
                pl.BlockSpec((1, tk_eff), lambda i, k: (0, k)),       # b1 hidden-slice
                pl.BlockSpec((tk_eff, dim_p), lambda i, k: (k, 0)),   # w2 hidden-slice
                pl.BlockSpec((1, dim_p), lambda i, k: (0, 0)),        # b2
            ],
            out_specs=pl.BlockSpec((tm_eff, dim_p), lambda i, k: (i, 0)),
            scratch_shapes=scratch_shapes,
        ),
        compiler_params=pltpu.CompilerParams(
            dimension_semantics=("parallel", "arbitrary"),
            vmem_limit_bytes=budget,
        ),
        cost_estimate=cost,
    )(x2, w1_p, b1_p, w2_p, b2_p)

    if (M_p, dim_p) != (M, dim):
        out2d = out2d[:M, :dim]
    return out2d


def feed_forward(x, params, *, tm=512, tk=512, use_tanh_gelu=False):
    """x: (..., dim); params from prepare_params().  Returns (..., dim).

    Fused Linear -> GELU -> Dropout(0) -> Linear -> Dropout(0) in one Pallas kernel.
    """
    dim = params["dim"]
    assert x.shape[-1] == dim, f"expected last dim {dim}, got {x.shape[-1]}"
    lead = x.shape[:-1]
    x2d = x.reshape(-1, dim)
    out2d = _ffn_2d(x2d, params["w1"], params["b1"], params["w2"], params["b2"],
                    tm_max=tm, tk_max=tk, use_tanh_gelu=use_tanh_gelu)
    return out2d.reshape(*lead, dim)


# ---------------------------------------------------------------------------
# Reference / test
# ---------------------------------------------------------------------------

def _init_params(key, dim, hidden_dim, dtype=jnp.float32):
    """Mimics torch.nn.Linear init (uniform +-1/sqrt(fan_in)); weights stored as
    (in_features, out_features), i.e. already transposed for row-major matmul."""
    k1, k2, k3, k4 = jax.random.split(key, 4)
    bound1 = 1.0 / math.sqrt(dim)
    bound2 = 1.0 / math.sqrt(hidden_dim)
    w1 = jax.random.uniform(k1, (dim, hidden_dim), dtype, -bound1, bound1)
    b1 = jax.random.uniform(k2, (hidden_dim,), dtype, -bound1, bound1)
    w2 = jax.random.uniform(k3, (hidden_dim, dim), dtype, -bound2, bound2)
    b2 = jax.random.uniform(k4, (dim,), dtype, -bound2, bound2)
    return w1, b1, w2, b2


def _reference(x, w1, b1, w2, b2):
    h = jnp.dot(x, w1) + b1
    h = jax.nn.gelu(h, approximate=False)
    return jnp.dot(h, w2) + b2


if __name__ == "__main__":
    key = jax.random.PRNGKey(0)
    kx, kp = jax.random.split(key)

    batch, seq, dim, hidden_dim = 2, 8, 32, 64
    x = jax.random.normal(kx, (batch, seq, dim), dtype=jnp.float32)
    w1, b1, w2, b2 = _init_params(kp, dim, hidden_dim)
    ref = _reference(x, w1, b1, w2, b2)

    # 1) Exact f32 path (escape hatch) -> tight tolerance vs the f32 reference.
    params_f32 = prepare_params(w1, b1, w2, b2, compute_dtype=jnp.float32)
    out_f32 = jax.block_until_ready(feed_forward(x, params_f32))
    assert out_f32.shape == (batch, seq, dim)
    assert jnp.allclose(out_f32, ref, atol=1e-5, rtol=1e-5), "f32 path mismatch"

    # 2) Default bf16 MXU path (f32 accumulation) -> looser tolerance.
    params_bf16 = prepare_params(w1, b1, w2, b2)  # compute_dtype defaults to bf16
    out_bf16 = jax.block_until_ready(feed_forward(x, params_bf16))
    assert out_bf16.dtype == jnp.float32
    assert jnp.allclose(out_bf16, ref, atol=5e-2, rtol=5e-2), "bf16 path mismatch"

    # 3) bf16 activations/output (exercises the scratch-accumulator flush path).
    out_bf16_act = jax.block_until_ready(feed_forward(x.astype(jnp.bfloat16), params_bf16))
    assert out_bf16_act.dtype == jnp.bfloat16
    assert jnp.allclose(out_bf16_act.astype(jnp.float32), ref, atol=1e-1, rtol=1e-1), \
        "bf16-output path mismatch"

    print("KERNEL_OK")
</pallas_src>

<mosaic_0001>
module attributes {stable_mosaic.version = 11 : i64} {
  func.func @kernel(%arg0: i32, %arg1: i32, %arg2: memref<16x128xf32, #tpu.memory_space<vmem>>, %arg3: memref<128x128xf32, #tpu.memory_space<vmem>>, %arg4: memref<1x128xf32, #tpu.memory_space<vmem>>, %arg5: memref<128x128xf32, #tpu.memory_space<vmem>>, %arg6: memref<1x128xf32, #tpu.memory_space<vmem>>, %arg7: memref<16x128xf32, #tpu.memory_space<vmem>>) attributes {dimension_semantics = [#tpu.dimension_semantics<parallel>, #tpu.dimension_semantics<arbitrary>], iteration_bounds = array<i64: 1, 1>, scalar_prefetch = 0 : i64, scratch_operands = 0 : i64, tpu.core_type = #tpu.core_type<tc>, window_params = [{transform_indices = @transform_0, window_bounds = array<i64: 16, 128>}, {transform_indices = @transform_1, window_bounds = array<i64: 128, 128>}, {transform_indices = @transform_2, window_bounds = array<i64: 1, 128>}, {transform_indices = @transform_3, window_bounds = array<i64: 128, 128>}, {pipeline_mode = #tpu.pipeline_mode<synchronous>, transform_indices = @transform_4, window_bounds = array<i64: 1, 128>}, {transform_indices = @transform_5, window_bounds = array<i64: 16, 128>}]} {
    %c0_i32 = arith.constant 0 : i32
    %0 = arith.cmpi eq, %arg1, %c0_i32 : i32
    %1 = arith.extui %0 : i1 to i32
    %c0_i32_0 = arith.constant 0 : i32
    %2 = arith.cmpi ne, %1, %c0_i32_0 : i32
    scf.if %2 {
      %c0_16 = arith.constant 0 : index
      %c0_17 = arith.constant 0 : index
      %22 = vector.load %arg6[%c0_16, %c0_17] : memref<1x128xf32, #tpu.memory_space<vmem>>, vector<1x128xf32>
      %23 = vector.shape_cast %22 : vector<1x128xf32> to vector<1x128xf32>
      %24 = vector.broadcast %23 : vector<1x128xf32> to vector<16x128xf32>
      %c0_18 = arith.constant 0 : index
      %c0_19 = arith.constant 0 : index
      %25 = vector.load %arg7[%c0_18, %c0_19] : memref<16x128xf32, #tpu.memory_space<vmem>>, vector<16x128xf32>
      tpu.vector_store %arg7[%c0_18, %c0_19], %24 {strides = array<i32>} : memref<16x128xf32, #tpu.memory_space<vmem>>, vector<16x128xf32>,
    } else {
    }
    %c0 = arith.constant 0 : index
    %c0_1 = arith.constant 0 : index
    %3 = vector.load %arg2[%c0, %c0_1] : memref<16x128xf32, #tpu.memory_space<vmem>>, vector<16x128xf32>
    %c0_2 = arith.constant 0 : index
    %c0_3 = arith.constant 0 : index
    %4 = vector.load %arg3[%c0_2, %c0_3] : memref<128x128xf32, #tpu.memory_space<vmem>>, vector<128x128xf32>
    %cst = arith.constant dense<0.000000e+00> : vector<16x128xf32>
    %5 = tpu.matmul %3, %4, %cst {dimension_numbers = #tpu.dot_dimension_numbers<[1], [0], [0], [1], [0, 0, 1, 1], [], []>} : vector<16x128xf32>, vector<128x128xf32>, vector<16x128xf32> -> vector<16x128xf32>
    %c0_4 = arith.constant 0 : index
    %c0_5 = arith.constant 0 : index
    %6 = vector.load %arg4[%c0_4, %c0_5] : memref<1x128xf32, #tpu.memory_space<vmem>>, vector<1x128xf32>
    %7 = vector.broadcast %6 : vector<1x128xf32> to vector<16x128xf32>
    %8 = arith.addf %5, %7 : vector<16x128xf32>
    %cst_6 = arith.constant 5.000000e-01 : f32
    %9 = vector.broadcast %cst_6 : f32 to vector<16x128xf32>
    %10 = arith.mulf %9, %8 : vector<16x128xf32>
    %cst_7 = arith.constant 0.707106769 : f32
    %11 = vector.broadcast %cst_7 : f32 to vector<16x128xf32>
    %12 = arith.mulf %8, %11 : vector<16x128xf32>
    %13 = math.erf %12 : vector<16x128xf32>
    %cst_8 = arith.constant 1.000000e+00 : f32
    %14 = vector.broadcast %cst_8 : f32 to vector<16x128xf32>
    %15 = arith.addf %14, %13 : vector<16x128xf32>
    %16 = arith.mulf %10, %15 : vector<16x128xf32>
    %c0_9 = arith.constant 0 : index
    %c0_10 = arith.constant 0 : index
    %17 = vector.load %arg7[%c0_9, %c0_10] : memref<16x128xf32, #tpu.memory_space<vmem>>, vector<16x128xf32>
    %c0_11 = arith.constant 0 : index
    %c0_12 = arith.constant 0 : index
    %18 = vector.load %arg5[%c0_11, %c0_12] : memref<128x128xf32, #tpu.memory_space<vmem>>, vector<128x128xf32>
    %cst_13 = arith.constant dense<0.000000e+00> : vector<16x128xf32>
    %19 = tpu.matmul %16, %18, %cst_13 {dimension_numbers = #tpu.dot_dimension_numbers<[1], [0], [0], [1], [0, 0, 1, 1], [], []>} : vector<16x128xf32>, vector<128x128xf32>, vector<16x128xf32> -> vector<16x128xf32>
    %20 = arith.addf %17, %19 : vector<16x128xf32>
    %c0_14 = arith.constant 0 : index
    %c0_15 = arith.constant 0 : index
    %21 = vector.load %arg7[%c0_14, %c0_15] : memref<16x128xf32, #tpu.memory_space<vmem>>, vector<16x128xf32>
    tpu.vector_store %arg7[%c0_14, %c0_15], %20 {strides = array<i32>} : memref<16x128xf32, #tpu.memory_space<vmem>>, vector<16x128xf32>,
    return
  }
  func.func @transform_0(%arg0: i32, %arg1: i32) -> (i32, i32) {
    %c0_i32 = arith.constant 0 : i32
    %c0_i32_0 = arith.constant 0 : i32
    return %arg0, %c0_i32 : i32, i32
  }
  func.func @transform_1(%arg0: i32, %arg1: i32) -> (i32, i32) {
    %c0_i32 = arith.constant 0 : i32
    %c0_i32_0 = arith.constant 0 : i32
    return %c0_i32, %arg1 : i32, i32
  }
  func.func @transform_2(%arg0: i32, %arg1: i32) -> (i32, i32) {
    %c0_i32 = arith.constant 0 : i32
    %c0_i32_0 = arith.constant 0 : i32
    return %c0_i32, %arg1 : i32, i32
  }
  func.func @transform_3(%arg0: i32, %arg1: i32) -> (i32, i32) {
    %c0_i32 = arith.constant 0 : i32
    %c0_i32_0 = arith.constant 0 : i32
    return %arg1, %c0_i32 : i32, i32
  }
  func.func @transform_4(%arg0: i32, %arg1: i32) -> (i32, i32) {
    %c0_i32 = arith.constant 0 : i32
    %c0_i32_0 = arith.constant 0 : i32
    %c0_i32_1 = arith.constant 0 : i32
    return %c0_i32, %c0_i32_0 : i32, i32
  }
  func.func @transform_5(%arg0: i32, %arg1: i32) -> (i32, i32) {
    %c0_i32 = arith.constant 0 : i32
    %c0_i32_0 = arith.constant 0 : i32
    return %arg0, %c0_i32 : i32, i32
  }
}

</mosaic_0001>

<bundles_post_ra>
// kernel: _ffn_2d.1
= control target key start
LH: loop header
LB: loop body
LE: loop exit
PB: predicated region body
PF: predicated region fallthrough
CT: control target
= control target key end

     0   :  { %10 = vsyncpa [#allocation3], 0  ;;  %s479_s0 = inlined_call_operand.vmem [shape: f32[16,128], index: 0, kind: input, shape index: {}]   ;;  %s480_s1 = inlined_call_operand.hbm [shape: f32[128,128], index: 1, kind: input, shape index: {}]   ;;  %s481_s2 = inlined_call_operand.vmem [shape: f32[1,128], index: 2, kind: input, shape index: {}]   ;;  %s482_s3 = inlined_call_operand.hbm [shape: f32[128,128], index: 3, kind: input, shape index: {}]   ;;  %s483_s4 = inlined_call_operand.vmem [shape: f32[1,128], index: 4, kind: input, shape index: {}]   ;;  %s484_s5 = inlined_call_operand.hbm [shape: f32[16,128], index: 5, kind: output, shape index: {}]  }
   0x1   :  { %11 = vsyncpa [#allocation6], 0 }
   0x2   :  { %12 = vsyncpa [#allocation4], 0  ;;  %s19_s20 = sshll.u32 %s480_s1, 4  ;;  %s384_s21 = smov [#allocation2]   ;;  %s20_s20 = int_to_ptr.hbm [resolvable:$true] %s19_s20 }
   0x3   :  { %s21_s22 = sshll.u32 %s384_s21, 4  ;;  %s34_s25 = sshll.u32 %s482_s3, 4  ;;  %s22_s22 = int_to_ptr.vmem [resolvable:$true] %s21_s22  ;;  %s35_s25 = int_to_ptr.hbm [resolvable:$true] %s34_s25 }
   0x4   :  { %s385_s26 = smov 128   ;;  %s386_s27 = smov 8  }
   0x5   :  { %27 = dma.hbm_to_vmem [thread:$0]  %s20_s20, 2048, %s22_s22, [#allocation3], %s385_s26, %s385_s26, %s386_s27  }
   0x6   :  { %s387_s28 = smov [#allocation5]  }
   0x7   :  { %s36_s29 = sshll.u32 %s387_s28, 4  ;;  %s37_s29 = int_to_ptr.vmem [resolvable:$true] %s36_s29 }
   0x8   :  { %42 = dma.hbm_to_vmem [thread:$0]  %s35_s25, 2048, %s37_s29, [#allocation6], %s385_s26, %s385_s26, %s386_s27  }
   0x9   :  { %378 = dma.done.wait [#allocation3], 2048  }
   0xa   :  { %379 = vsyncadd [#allocation3], 4294965248 }
   0xb   :  { %380 = dma.done.wait [#allocation6], 2048  }
   0xc   :  { %381 = vsyncadd [#allocation6], 4294965248  ;;  %v80_v0 = vld [vmem:[#allocation2 + $0x78] sm:$0xff]  ;;  %v79_v1 = vld [vmem:[#allocation2 + $0x70] sm:$0xff]  ;;  %s388_s9 = smov [#allocation7]   ;;  %s247_s13 = sshll.u32 %s484_s5, 4  ;;  %s248_s13 = int_to_ptr.hbm [resolvable:$true] %s247_s13 }
   0xd   :  { %85 = vmatpush.msra.mxu0 %v80_v0  ;;  %263 = vmatpush.msra.mxu2 %v80_v0  ;;  %v78_v2 = vld [vmem:[#allocation2 + $0x68] sm:$0xff]  ;;  %v77_v3 = vld [vmem:[#allocation2 + $0x60] sm:$0xff]  ;;  %v76_v4 = vld [vmem:[#allocation2 + $0x58] sm:$0xff]  ;;  %s245_s10 = sshll.u32 %s388_s9, 4  ;;  %s246_s10 = int_to_ptr.vmem [resolvable:$true] %s245_s10 }
   0xe   :  { %v75_v5 = vld [vmem:[#allocation2 + $0x50] sm:$0xff]  ;;  %v74_v6 = vld [vmem:[#allocation2 + $0x48] sm:$0xff]  ;;  %v73_v7 = vld [vmem:[#allocation2 + $0x40] sm:$0xff] }
   0xf   :  { %86 = vmatpush.msra.mxu0 %v79_v1  ;;  %264 = vmatpush.msra.mxu2 %v79_v1  ;;  %v72_v8 = vld [vmem:[#allocation2 + $0x38] sm:$0xff]  ;;  %v71_v9 = vld [vmem:[#allocation2 + $0x30] sm:$0xff]  ;;  %v70_v10 = vld [vmem:[#allocation2 + $0x28] sm:$0xff] }
  0x10   :  { %v69_v11 = vld [vmem:[#allocation2 + $0x20] sm:$0xff]  ;;  %v68_v12 = vld [vmem:[#allocation2 + $0x18] sm:$0xff]  ;;  %v67_v13 = vld [vmem:[#allocation2 + $0x10] sm:$0xff] }
  0x11   :  { %87 = vmatpush.msra.mxu0 %v78_v2  ;;  %265 = vmatpush.msra.mxu2 %v78_v2  ;;  %v66_v14 = vld [vmem:[#allocation2 + $0x8] sm:$0xff]  ;;  %v65_v15 = vld [vmem:[#allocation2] sm:$0xff]  ;;  %v213_v18 = vld [vmem:[#allocation5 + $0x78] sm:$0xff] }
  0x12   :  { %v63_v16 = vld [vmem:[%s479_s0] sm:$0xff]  ;;  %v64_v17 = vld [vmem:[%s479_s0 + $0x8] sm:$0xff]  ;;  %214 = vmatpush.msra.mxu1 %v213_v18  ;;  %279 = vmatpush.msra.mxu3 %v213_v18  ;;  %v212_v19 = vld [vmem:[#allocation5 + $0x70] sm:$0xff] }
  0x13   :  { %88 = vmatpush.msra.mxu0 %v77_v3  ;;  %266 = vmatpush.msra.mxu2 %v77_v3  ;;  %v211_v20 = vld [vmem:[#allocation5 + $0x68] sm:$0xff]  ;;  %v210_v21 = vld [vmem:[#allocation5 + $0x60] sm:$0xff]  ;;  %v209_v23 = vld [vmem:[#allocation5 + $0x58] sm:$0xff] }
  0x14   :  { %215 = vmatpush.msra.mxu1 %v212_v19  ;;  %280 = vmatpush.msra.mxu3 %v212_v19  ;;  %v300_v22 = vld [vmem:[%s481_s2] ss:$0 sm:$0xff]  ;;  %v208_v25 = vld [vmem:[#allocation5 + $0x50] sm:$0xff]  ;;  %v207_v27 = vld [vmem:[#allocation5 + $0x48] sm:$0xff] }
  0x15   :  { %89 = vmatpush.msra.mxu0 %v76_v4  ;;  %267 = vmatpush.msra.mxu2 %v76_v4  ;;  %v206_v29 = vld [vmem:[#allocation5 + $0x40] sm:$0xff]  ;;  %v205_v30 = vld [vmem:[#allocation5 + $0x38] sm:$0xff]  ;;  %v204_v33 = vld [vmem:[#allocation5 + $0x30] sm:$0xff] }
  0x16   :  { %216 = vmatpush.msra.mxu1 %v211_v20  ;;  %281 = vmatpush.msra.mxu3 %v211_v20  ;;  %v203_v36 = vld [vmem:[#allocation5 + $0x28] sm:$0xff]  ;;  %v202_v39 = vld [vmem:[#allocation5 + $0x20] sm:$0xff]  ;;  %v201_v43 = vld [vmem:[#allocation5 + $0x18] sm:$0xff] }
  0x17   :  { %90 = vmatpush.msra.mxu0 %v75_v5  ;;  %268 = vmatpush.msra.mxu2 %v75_v5  ;;  %v200_v47 = vld [vmem:[#allocation5 + $0x10] sm:$0xff]  ;;  %v199_v52 = vld [vmem:[#allocation5 + $0x8] sm:$0xff]  ;;  %v198_v56 = vld [vmem:[#allocation5] sm:$0xff] }
  0x18   :  { %217 = vmatpush.msra.mxu1 %v210_v21  ;;  %282 = vmatpush.msra.mxu3 %v210_v21 }
  0x19   :  { %91 = vmatpush.msra.mxu0 %v74_v6  ;;  %269 = vmatpush.msra.mxu2 %v74_v6 }
  0x1a   :  { %218 = vmatpush.msra.mxu1 %v209_v23  ;;  %283 = vmatpush.msra.mxu3 %v209_v23 }
  0x1b   :  { %92 = vmatpush.msra.mxu0 %v73_v7  ;;  %270 = vmatpush.msra.mxu2 %v73_v7 }
  0x1c   :  { %219 = vmatpush.msra.mxu1 %v208_v25  ;;  %284 = vmatpush.msra.mxu3 %v208_v25 }
  0x1d   :  { %93 = vmatpush.msra.mxu0 %v72_v8  ;;  %271 = vmatpush.msra.mxu2 %v72_v8 }
  0x1e   :  { %220 = vmatpush.msra.mxu1 %v207_v27  ;;  %285 = vmatpush.msra.mxu3 %v207_v27 }
  0x1f   :  { %94 = vmatpush.msra.mxu0 %v71_v9  ;;  %272 = vmatpush.msra.mxu2 %v71_v9 }
  0x20   :  { %221 = vmatpush.msra.mxu1 %v206_v29  ;;  %286 = vmatpush.msra.mxu3 %v206_v29 }
  0x21   :  { %95 = vmatpush.msra.mxu0 %v70_v10  ;;  %273 = vmatpush.msra.mxu2 %v70_v10 }
  0x22   :  { %222 = vmatpush.msra.mxu1 %v205_v30  ;;  %287 = vmatpush.msra.mxu3 %v205_v30 }
  0x23   :  { %96 = vmatpush.msra.mxu0 %v69_v11  ;;  %274 = vmatpush.msra.mxu2 %v69_v11 }
  0x24   :  { %223 = vmatpush.msra.mxu1 %v204_v33  ;;  %288 = vmatpush.msra.mxu3 %v204_v33 }
  0x25   :  { %97 = vmatpush.msra.mxu0 %v68_v12  ;;  %275 = vmatpush.msra.mxu2 %v68_v12 }
  0x26   :  { %224 = vmatpush.msra.mxu1 %v203_v36  ;;  %289 = vmatpush.msra.mxu3 %v203_v36 }
  0x27   :  { %98 = vmatpush.msra.mxu0 %v67_v13  ;;  %276 = vmatpush.msra.mxu2 %v67_v13 }
  0x28   :  { %225 = vmatpush.msra.mxu1 %v202_v39  ;;  %290 = vmatpush.msra.mxu3 %v202_v39 }
  0x29   :  { %99 = vmatpush.msra.mxu0 %v66_v14  ;;  %277 = vmatpush.msra.mxu2 %v66_v14 }
  0x2a   :  { %226 = vmatpush.msra.mxu1 %v201_v43  ;;  %291 = vmatpush.msra.mxu3 %v201_v43 }
  0x2b   :  { %100 = vmatpush.msra.mxu0 %v65_v15  ;;  %278 = vmatpush.msra.mxu2 %v65_v15 }
  0x2c   :  { %101 = vmatmul.f32.vlgmr.msra.gmra.mxu0 %v63_v16  ;;  %104 = vmatmul.f32.vlgmr.msra.gmra.mxu2 %v64_v17 }
  0x2d   :  { %227 = vmatpush.msra.mxu1 %v200_v47  ;;  %292 = vmatpush.msra.mxu3 %v200_v47 }
  0x2f   :  { %228 = vmatpush.msra.mxu1 %v199_v52  ;;  %293 = vmatpush.msra.mxu3 %v199_v52 }
  0x31   :  { %229 = vmatpush.msra.mxu1 %v198_v56  ;;  %294 = vmatpush.msra.mxu3 %v198_v56  ;;  %v301_v56 = vld [vmem:[%s483_s4] ss:$0 sm:$0xff] }
  0xa9   :  { %v102_v24 = vpop.f32.mrf.mxu0 }
  0xaa   :  { %v440_v26 = vadd.f32 %v300_v22, %v102_v24 }
  0xac   :  { %v443_v28 = vmul.f32 0.70710677, %v440_v26  ;;  %v108_v47 = vmul.f32 0.5, %v440_v26 }
  0xae   :  { %v112_v31 = vmul.f32 %v443_v28, %v443_v28 }
  0xaf   :  { %v105_v32 = vpop.f32.mrf.mxu2 }
  0xb0   :  { %v447_v34 = vmin.f32 %v112_v31, 16.0  ;;  %v449_v35 = vadd.f32 %v300_v22, %v105_v32 }
  0xb2   :  { %v114_v37 = vmul.f32 2.1237322e-06, %v447_v34  ;;  %v453_v38 = vmul.f32 0.70710677, %v449_v35  ;;  %v125_v40 = vmul.f32 3.8918573e-05, %v447_v34 }
  0xb4   :  { %v115_v41 = vadd.f32 0.00028619796, %v114_v37  ;;  %v152_v42 = vmul.f32 %v453_v38, %v453_v38  ;;  %v126_v44 = vadd.f32 0.001143296, %v125_v40 }
  0xb6   :  { %v116_v45 = vmul.f32 %v115_v41, %v447_v34  ;;  %v153_v46 = vmin.f32 %v152_v42, 16.0  ;;  %v127_v48 = vmul.f32 %v126_v44, %v447_v34 }
  0xb8   :  { %v154_v49 = vmul.f32 2.1237322e-06, %v153_v46  ;;  %v165_v50 = vmul.f32 3.8918573e-05, %v153_v46  ;;  %v117_v51 = vadd.f32 0.0036580483, %v116_v45 }
  0xb9   :  { %v128_v53 = vadd.f32 0.014752088, %v127_v48 }
  0xba   :  { %v155_v54 = vadd.f32 0.00028619796, %v154_v49  ;;  %v166_v55 = vadd.f32 0.001143296, %v165_v50  ;;  %v118_v60 = vmul.f32 %v117_v51, %v447_v34 }
  0xbb   :  { %v129_v57 = vmul.f32 %v128_v53, %v447_v34  ;;  %v109_v53 = vmul.f32 0.5, %v449_v35 }
  0xbc   :  { %v156_v58 = vmul.f32 %v155_v54, %v153_v46  ;;  %v167_v59 = vmul.f32 %v166_v55, %v153_v46  ;;  %v119_v2 = vadd.f32 0.05243302, %v118_v60 }
  0xbd   :  { %v130_v61 = vadd.f32 0.112945676, %v129_v57 }
  0xbe   :  { %v157_v62 = vadd.f32 0.0036580483, %v156_v58  ;;  %v168_v63 = vadd.f32 0.014752088, %v167_v59  ;;  %v120_v8 = vmul.f32 %v119_v2, %v447_v34 }
  0xbf   :  { %v131_v0 = vmul.f32 %v130_v61, %v447_v34 }
  0xc0   :  { %v169_v1 = vmul.f32 %v168_v63, %v153_v46  ;;  %v158_v4 = vmul.f32 %v157_v62, %v153_v46  ;;  %v121_v13 = vadd.f32 0.18741608, %v120_v8 }
  0xc1   :  { %v132_v3 = vadd.f32 0.4994258, %v131_v0 }
  0xc2   :  { %v170_v5 = vadd.f32 0.112945676, %v169_v1  ;;  %v159_v10 = vadd.f32 0.05243302, %v158_v4  ;;  %v122_v17 = vmul.f32 %v121_v13, %v447_v34 }
  0xc3   :  { %v133_v6 = vmul.f32 %v132_v3, %v447_v34 }
  0xc4   :  { %v171_v7 = vmul.f32 %v170_v5, %v153_v46  ;;  %v160_v14 = vmul.f32 %v159_v10, %v153_v46  ;;  %v123_v21 = vadd.f32 1.1283791, %v122_v17 }
  0xc5   :  { %v134_v9 = vadd.f32 1.0, %v133_v6 }
  0xc6   :  { %v172_v11 = vadd.f32 0.4994258, %v171_v7  ;;  %v161_v18 = vadd.f32 0.18741608, %v160_v14  ;;  %v124_v31 = vmul.f32 %v123_v21, %v443_v28 }
  0xc7   :  { %302 = vrcp.f32 %v134_v9  ;;  %v146_v22 = vand.u32 2147483648, %v134_v9  ;;  %v144_v27 = vand.u32 2147483647, %v134_v9  ;;  %vm140_vm1 = vweird.f32 %v134_v9 }
  0xc8   :  { %v173_v12 = vmul.f32 %v172_v11, %v153_v46  ;;  %v162_v24 = vmul.f32 %v161_v18, %v153_v46 }
  0xc9   :  { %v147_v32 = vor.u32 1.1754944e-38, %v146_v22  ;;  %vm145_vm3 = vcmp.eq.f32.partialorder %v144_v27, 8.507059e+37 }
  0xca   :  { %v174_v15 = vadd.f32 1.0, %v173_v12  ;;  %v163_v36 = vadd.f32 1.1283791, %v162_v24 }
  0xcc   :  { %304 = vrcp.f32 %v174_v15  ;;  %v186_v37 = vand.u32 2147483648, %v174_v15  ;;  %v184_v41 = vand.u32 2147483647, %v174_v15  ;;  %vm180_vm5 = vweird.f32 %v174_v15 }
  0xcd   :  { %v303_v16 = vpop.eup %302  ;;  %v164_v46 = vmul.f32 %v163_v36, %v453_v38 }
  0xce   :  { %v136_v19 = vmul.f32 %v303_v16, %v134_v9  ;;  %vm141_vm0 = vweird.f32 %v303_v16  ;;  %v187_v45 = vor.u32 1.1754944e-38, %v186_v37  ;;  %vm185_vm7 = vcmp.eq.f32.partialorder %v184_v41, 8.507059e+37 }
  0xcf   :  { %vm142_vm2 = vmor %vm140_vm1, %vm141_vm0 }
  0xd0   :  { %v137_v20 = vsub.f32 1.0, %v136_v19 }
  0xd2   :  { %v305_v23 = vpop.eup %304  ;;  %v138_v25 = vmul.f32 %v303_v16, %v137_v20 }
  0xd3   :  { %v176_v29 = vmul.f32 %v305_v23, %v174_v15  ;;  %vm181_vm4 = vweird.f32 %v305_v23 }
  0xd4   :  { %v139_v30 = vadd.f32 %v303_v16, %v138_v25  ;;  %vm182_vm6 = vmor %vm180_vm5, %vm181_vm4 }
  0xd5   :  { %v177_v33 = vsub.f32 1.0, %v176_v29 }
  0xd6   :  { %v143_v34 = vsel %vm142_vm2, %v303_v16, %v139_v30 }
  0xd7   :  { %v148_v39 = vsel %vm145_vm3, %v147_v32, %v143_v34  ;;  %v178_v40 = vmul.f32 %v305_v23, %v177_v33 }
  0xd8   :  { %v149_v42 = vmul.f32 %v148_v39, %v124_v31 }
  0xd9   :  { %v179_v43 = vadd.f32 %v305_v23, %v178_v40 }
  0xda   :  { %v261_v44 = vclamps-f32 %v149_v42, 1.0 }
  0xdb   :  { %v183_v28 = vsel %vm182_vm6, %v305_v23, %v179_v43 }
  0xdc   :  { %v192_v48 = vadd.f32 1.0, %v261_v44  ;;  %v188_v49 = vsel %vm185_vm7, %v187_v45, %v183_v28 }
  0xdd   :  { %v189_v50 = vmul.f32 %v188_v49, %v164_v46 }
  0xde   :  { %v194_v51 = vmul.f32 %v192_v48, %v108_v47 }
  0xdf   :  { %v262_v52 = vclamps-f32 %v189_v50, 1.0 }
  0xe0   :  { %230 = vmatmul.f32.vlgmr.msra.gmra.mxu1 %v194_v51 }
  0xe1   :  { %v193_v54 = vadd.f32 1.0, %v262_v52 }
  0xe3   :  { %v195_v55 = vmul.f32 %v193_v54, %v109_v53 }
  0xe5   :  { %233 = vmatmul.f32.vlgmr.msra.gmra.mxu3 %v195_v55 }
 0x15d   :  { %v231_v38 = vpop.f32.mrf.mxu1 }
 0x15e   :  { %v237_v57 = vadd.f32 %v301_v56, %v231_v38 }
 0x160   :  { %239 = vst [vmem:[#allocation7] sm:$0xff] %v237_v57 }
 0x168   :  { %v234_v26 = vpop.f32.mrf.mxu3 }
 0x169   :  { %v238_v58 = vadd.f32 %v301_v56, %v234_v26 }
 0x16b   :  { %240 = vst [vmem:[#allocation7 + $0x8] sm:$0xff] %v238_v58 }
 0x16c   :  { %253 = dma.vmem_to_hbm [thread:$0]  %s246_s10, 256, %s248_s13, [#allocation4], %s385_s26, %s385_s26, %s386_s27  }
 0x16d   :  { %382 = dma.done.wait [#allocation4], 256  }
 0x16e   :  { %383 = vsyncadd [#allocation4], 4294967040 }
 0x16f   :  { %258 = vsyncpa [#allocation3], 1 }
 0x170   :  { %259 = vsyncpa [#allocation6], 1 }
 0x171   :  { %260 = vsyncpa [#allocation4], 1 }

</bundles_post_ra>
